<compile_context>
chip_gen: v6e
topology: v6e:2x2x1
jax: 0.10.0
libtpu: 0.0.40
codegen_flags: <defaults>
</compile_context>

<pallas_src>
import jax
import jax.numpy as jnp
from jax.experimental import pallas as pl
from jax.experimental.pallas import tpu as pltpu

LORA_SCALING = 2.0  # lora_alpha / r  (16 / 8)


def _round_up(v, m):
    return (v + m - 1) // m * m


def _pick_vmem_limit():
    """Generation-aware scoped-VMEM limit with headroom for Mosaic scratch."""
    cap = 64 * 1024 * 1024  # conservative fallback (v7x-sized)
    try:
        cap = int(pltpu.get_tpu_info().vmem_capacity_bytes)
    except Exception:
        pass
    # Leave >=16 MiB headroom; never ask for more than 100 MiB.
    return max(32 * 1024 * 1024, min(cap - 16 * 1024 * 1024, 100 * 1024 * 1024))


def _const_spec(shape):
    """BlockSpec for a grid-invariant (weight) input: single-buffered."""
    idx = lambda *_: (0,) * len(shape)
    try:
        return pl.BlockSpec(shape, idx, pipeline_mode=pl.Buffered(1))
    except Exception:  # older jax without pipeline_mode / Buffered
        return pl.BlockSpec(shape, idx)


def _mix_kernel(scales_ref,       # SMEM (2,)  f32  [w1, w2 * lora_scaling]
                x_ref,            # VMEM (tm, Hp)   bf16
                w_ref,            # VMEM (Hp, Hp)   bf16  backbone weight
                b_ref,            # VMEM (1, Hp)    f32   backbone bias
                la_ref,           # VMEM (Hp, Rp)   bf16  lora_A
                lb_ref,           # VMEM (Rp, Hp)   bf16  lora_B
                ad_ref,           # VMEM (Hp, RAp)  bf16  adapter down weight
                adb_ref,          # VMEM (1, RAp)   f32   adapter down bias
                au_ref,           # VMEM (RAp, Hp)  bf16  adapter up weight
                aub_ref,          # VMEM (1, Hp)    f32   adapter up bias
                o_ref):           # VMEM (tm, Hp)   f32
    x = x_ref[...]
    w1 = scales_ref[0]            # softmax weight of the Adapter branch
    w2s = scales_ref[1]           # softmax weight of the Lora branch * lora scaling

    # branch 0 ('None'): backbone output, f32 accumulation.
    base = jnp.dot(x, w_ref[...], preferred_element_type=jnp.float32) + b_ref[...]

    # branch 1 ('Adapter') delta: relu(base @ Wd + bd) @ Wu + bu
    down = jnp.dot(base.astype(jnp.bfloat16), ad_ref[...],
                   preferred_element_type=jnp.float32) + adb_ref[...]
    act = jnp.maximum(down, 0.0)
    delta_ad = jnp.dot(act.astype(jnp.bfloat16), au_ref[...],
                       preferred_element_type=jnp.float32) + aub_ref[...]

    # branch 2 ('Lora') delta: (x @ A) @ B   (scaling folded into w2s scalar)
    lora_mid = jnp.dot(x, la_ref[...], preferred_element_type=jnp.float32)
    delta_lora = jnp.dot(lora_mid.astype(jnp.bfloat16), lb_ref[...],
                         preferred_element_type=jnp.float32)

    # Softmax mixture with w0 + w1 + w2 == 1:
    #   w0*base + w1*(base+Δad) + w2*(base+Δlora) = base + w1*Δad + w2*Δlora
    o_ref[...] = (base + w1 * delta_ad + w2s * delta_lora).astype(o_ref.dtype)


def prepare_params(params):
    """One-time weight prep: zero-pad + bf16 cast. Cache the result across calls."""
    H = params["W"].shape[0]
    r = params["lora_A"].shape[1]
    ra = params["ad_w"].shape[1]

    # Lane axis (H) padded to a full MXU tile; tiny ranks padded only to the
    # bf16 sublane pack (16), not 128.
    Hp = _round_up(H, 256 if H > 128 else 128)
    Rp = _round_up(r, 16)
    RAp = _round_up(ra, 16)

    def pad2(a, s0, s1, dtype):
        a = jnp.asarray(a, jnp.float32)
        return jnp.pad(a, ((0, s0 - a.shape[0]), (0, s1 - a.shape[1]))).astype(dtype)

    return dict(
        H=H, Hp=Hp, Rp=Rp, RAp=RAp,
        W=pad2(params["W"], Hp, Hp, jnp.bfloat16),
        b=pad2(params["b"], 1, Hp, jnp.float32),
        la=pad2(params["lora_A"], Hp, Rp, jnp.bfloat16),
        lb=pad2(params["lora_B"], Rp, Hp, jnp.bfloat16),
        ad=pad2(params["ad_w"], Hp, RAp, jnp.bfloat16),
        adb=pad2(params["ad_b"], 1, RAp, jnp.float32),
        au=pad2(params["au_w"], RAp, Hp, jnp.bfloat16),
        aub=pad2(params["au_b"], 1, Hp, jnp.float32),
    )


def mix_layer_parallel_forward(x, prep, alphas, *, tm=None):
    """x: (B, S, H) float32, prep: output of prepare_params. Returns (B, S, H) f32."""
    B, S, H = x.shape
    assert H == prep["H"]
    M = B * S
    Hp, Rp, RAp = prep["Hp"], prep["Rp"], prep["RAp"]

    vmem_limit = _pick_vmem_limit()
    if tm is None:
        tm = 512 if vmem_limit >= 80 * 1024 * 1024 else 256

    # Row tile: multiple of 16 (bf16 sublane pack); for moderate/large M cap so
    # there are >=2 grid steps ("parallel" can then shard across v7x's 2 TCs).
    tm_eff = min(tm, _round_up(M, 16))
    if M >= 256:
        tm_eff = min(tm_eff, _round_up((M + 1) // 2, 16))
    tm_eff = max(16, (tm_eff // 16) * 16)
    Mp = _round_up(M, tm_eff)
    grid = Mp // tm_eff

    # Tiny 3-way softmax (== F.softmax(self._alphas, -1)); only w1 and
    # w2*scaling reach the kernel, as f32 scalars (alpha-free hot path).
    w = jax.nn.softmax(alphas.astype(jnp.float32), axis=-1)
    scales = jnp.stack([w[1], w[2] * LORA_SCALING]).astype(jnp.float32)

    x2 = x.reshape(M, H).astype(jnp.float32)
    x_p = jnp.pad(x2, ((0, Mp - M), (0, Hp - H))).astype(jnp.bfloat16)

    out = pl.pallas_call(
        _mix_kernel,
        out_shape=jax.ShapeDtypeStruct((Mp, Hp), jnp.float32),
        grid_spec=pltpu.PrefetchScalarGridSpec(
            num_scalar_prefetch=0,
            grid=(grid,),
            in_specs=[
                pl.BlockSpec(memory_space=pltpu.MemorySpace.SMEM),   # softmax scales
                pl.BlockSpec((tm_eff, Hp), lambda i: (i, 0)),        # x tile (pipelined)
                _const_spec((Hp, Hp)),                               # backbone W
                _const_spec((1, Hp)),                                # backbone b
                _const_spec((Hp, Rp)),                               # lora_A
                _const_spec((Rp, Hp)),                               # lora_B
                _const_spec((Hp, RAp)),                              # adapter down W
                _const_spec((1, RAp)),                               # adapter down b
                _const_spec((RAp, Hp)),                              # adapter up W
                _const_spec((1, Hp)),                                # adapter up b
            ],
            out_specs=pl.BlockSpec((tm_eff, Hp), lambda i: (i, 0)),
        ),
        compiler_params=pltpu.CompilerParams(
            dimension_semantics=("parallel",),
            vmem_limit_bytes=vmem_limit,
        ),
    )(scales, x_p, prep["W"], prep["b"], prep["la"], prep["lb"],
      prep["ad"], prep["adb"], prep["au"], prep["aub"])

    return out[:M, :H].reshape(B, S, H)


def _reference(x, params, alphas):
    """Pure-JAX f32 reference mirroring the PyTorch forward."""
    B, S, H = x.shape
    x2 = x.reshape(B * S, H)
    base = x2 @ params["W"] + params["b"]
    down = jnp.maximum(base @ params["ad_w"] + params["ad_b"], 0.0)
    adapt = base + down @ params["au_w"] + params["au_b"]
    lora = base + (x2 @ params["lora_A"]) @ params["lora_B"] * LORA_SCALING
    stacked = jnp.stack([base, adapt, lora], axis=-1)          # (..., H, 3)
    w = jax.nn.softmax(alphas, axis=-1)
    mixed = jnp.sum(w * stacked, axis=-1)
    return mixed.reshape(B, S, H)


if __name__ == "__main__":
    B, S, H = 2, 8, 32
    r, ra = 8, 16
    num_parallel_module = 3

    key = jax.random.PRNGKey(0)
    keys = jax.random.split(key, 8)

    x = jax.random.normal(keys[0], (B, S, H), dtype=jnp.float32)

    params = {
        "W":      jax.random.normal(keys[1], (H, H), jnp.float32) * 0.1,
        "b":      jax.random.normal(keys[2], (1, H), jnp.float32) * 0.01,
        "lora_A": jax.random.normal(keys[3], (H, r), jnp.float32) * 0.1,
        # LoRA B is zero-initialized in practice; use small values to exercise the path.
        "lora_B": jax.random.normal(keys[4], (r, H), jnp.float32) * 0.05,
        "ad_w":   jax.random.normal(keys[5], (H, ra), jnp.float32) * 0.1,
        "ad_b":   jnp.zeros((1, ra), jnp.float32),
        "au_w":   jax.random.normal(keys[6], (ra, H), jnp.float32) * 0.1,
        "au_b":   jnp.zeros((1, H), jnp.float32),
    }

    # forward() default: alphas = ones(num_parallel_module) / 1000
    alphas = jnp.ones((num_parallel_module,), jnp.float32) / 1000.0

    prep = prepare_params(params)               # one-time padding / bf16 cast
    out = mix_layer_parallel_forward(x, prep, alphas)
    out = jax.block_until_ready(out)

    ref = _reference(x, params, alphas)
    assert out.shape == (B, S, H)
    # bf16 weights/activations with f32 accumulation -> loosened tolerance.
    assert jnp.allclose(out, ref, atol=3e-2, rtol=3e-2)

    # TODO(synk): BitFit / Compacter / Prefix / LowRankAdapter branches depend on
    # external delta classes (bias-only copies, hypercomplex layers) and are not
    # modeled here.
    print("KERNEL_OK")
</pallas_src>

<mosaic_0001>
module attributes {stable_mosaic.version = 11 : i64} {
  func.func @_mix_kernel(%arg0: i32, %arg1: memref<2xf32, #tpu.memory_space<smem>>, %arg2: memref<16x128xbf16, #tpu.memory_space<vmem>>, %arg3: memref<128x128xbf16, #tpu.memory_space<vmem>>, %arg4: memref<1x128xf32, #tpu.memory_space<vmem>>, %arg5: memref<128x16xbf16, #tpu.memory_space<vmem>>, %arg6: memref<16x128xbf16, #tpu.memory_space<vmem>>, %arg7: memref<128x16xbf16, #tpu.memory_space<vmem>>, %arg8: memref<1x16xf32, #tpu.memory_space<vmem>>, %arg9: memref<16x128xbf16, #tpu.memory_space<vmem>>, %arg10: memref<1x128xf32, #tpu.memory_space<vmem>>, %arg11: memref<16x128xf32, #tpu.memory_space<vmem>>) attributes {dimension_semantics = [#tpu.dimension_semantics<parallel>], iteration_bounds = array<i64: 1>, scalar_prefetch = 0 : i64, scratch_operands = 0 : i64, tpu.core_type = #tpu.core_type<tc>, window_params = [{transform_indices = @transform_0, window_bounds = array<i64: 2>}, {transform_indices = @transform_1, window_bounds = array<i64: 16, 128>}, {pipeline_mode = #tpu.pipeline_mode<synchronous>, transform_indices = @transform_2, window_bounds = array<i64: 128, 128>}, {pipeline_mode = #tpu.pipeline_mode<synchronous>, transform_indices = @transform_3, window_bounds = array<i64: 1, 128>}, {pipeline_mode = #tpu.pipeline_mode<synchronous>, transform_indices = @transform_4, window_bounds = array<i64: 128, 16>}, {pipeline_mode = #tpu.pipeline_mode<synchronous>, transform_indices = @transform_5, window_bounds = array<i64: 16, 128>}, {pipeline_mode = #tpu.pipeline_mode<synchronous>, transform_indices = @transform_6, window_bounds = array<i64: 128, 16>}, {pipeline_mode = #tpu.pipeline_mode<synchronous>, transform_indices = @transform_7, window_bounds = array<i64: 1, 16>}, {pipeline_mode = #tpu.pipeline_mode<synchronous>, transform_indices = @transform_8, window_bounds = array<i64: 16, 128>}, {pipeline_mode = #tpu.pipeline_mode<synchronous>, transform_indices = @transform_9, window_bounds = array<i64: 1, 128>}, {transform_indices = @transform_10, window_bounds = array<i64: 16, 128>}]} {
    %c0 = arith.constant 0 : index
    %c0_0 = arith.constant 0 : index
    %0 = vector.load %arg2[%c0, %c0_0] : memref<16x128xbf16, #tpu.memory_space<vmem>>, vector<16x128xbf16>
    %c0_1 = arith.constant 0 : index
    %1 = memref.load %arg1[%c0_1] : memref<2xf32, #tpu.memory_space<smem>>
    %c1 = arith.constant 1 : index
    %2 = memref.load %arg1[%c1] : memref<2xf32, #tpu.memory_space<smem>>
    %c0_2 = arith.constant 0 : index
    %c0_3 = arith.constant 0 : index
    %3 = vector.load %arg3[%c0_2, %c0_3] : memref<128x128xbf16, #tpu.memory_space<vmem>>, vector<128x128xbf16>
    %cst = arith.constant dense<0.000000e+00> : vector<16x128xf32>
    %4 = tpu.matmul %0, %3, %cst {dimension_numbers = #tpu.dot_dimension_numbers<[1], [0], [0], [1], [0, 0, 1, 1], [], []>} : vector<16x128xbf16>, vector<128x128xbf16>, vector<16x128xf32> -> vector<16x128xf32>
    %c0_4 = arith.constant 0 : index
    %c0_5 = arith.constant 0 : index
    %5 = vector.load %arg4[%c0_4, %c0_5] : memref<1x128xf32, #tpu.memory_space<vmem>>, vector<1x128xf32>
    %6 = vector.broadcast %5 : vector<1x128xf32> to vector<16x128xf32>
    %7 = arith.addf %4, %6 : vector<16x128xf32>
    %8 = arith.truncf %7 : vector<16x128xf32> to vector<16x128xbf16>
    %c0_6 = arith.constant 0 : index
    %c0_7 = arith.constant 0 : index
    %9 = vector.load %arg7[%c0_6, %c0_7] : memref<128x16xbf16, #tpu.memory_space<vmem>>, vector<128x16xbf16>
    %cst_8 = arith.constant dense<0.000000e+00> : vector<16x16xf32>
    %10 = tpu.matmul %8, %9, %cst_8 {dimension_numbers = #tpu.dot_dimension_numbers<[1], [0], [0], [1], [0, 0, 1, 1], [], []>} : vector<16x128xbf16>, vector<128x16xbf16>, vector<16x16xf32> -> vector<16x16xf32>
    %c0_9 = arith.constant 0 : index
    %c0_10 = arith.constant 0 : index
    %11 = vector.load %arg8[%c0_9, %c0_10] : memref<1x16xf32, #tpu.memory_space<vmem>>, vector<1x16xf32>
    %12 = vector.broadcast %11 : vector<1x16xf32> to vector<16x16xf32>
    %13 = arith.addf %10, %12 : vector<16x16xf32>
    %cst_11 = arith.constant 0.000000e+00 : f32
    %14 = vector.broadcast %cst_11 : f32 to vector<16x16xf32>
    %15 = arith.maximumf %13, %14 : vector<16x16xf32>
    %16 = arith.truncf %15 : vector<16x16xf32> to vector<16x16xbf16>
    %c0_12 = arith.constant 0 : index
    %c0_13 = arith.constant 0 : index
    %17 = vector.load %arg9[%c0_12, %c0_13] : memref<16x128xbf16, #tpu.memory_space<vmem>>, vector<16x128xbf16>
    %cst_14 = arith.constant dense<0.000000e+00> : vector<16x128xf32>
    %18 = tpu.matmul %16, %17, %cst_14 {dimension_numbers = #tpu.dot_dimension_numbers<[1], [0], [0], [1], [0, 0, 1, 1], [], []>} : vector<16x16xbf16>, vector<16x128xbf16>, vector<16x128xf32> -> vector<16x128xf32>
    %c0_15 = arith.constant 0 : index
    %c0_16 = arith.constant 0 : index
    %19 = vector.load %arg10[%c0_15, %c0_16] : memref<1x128xf32, #tpu.memory_space<vmem>>, vector<1x128xf32>
    %20 = vector.broadcast %19 : vector<1x128xf32> to vector<16x128xf32>
    %21 = arith.addf %18, %20 : vector<16x128xf32>
    %c0_17 = arith.constant 0 : index
    %c0_18 = arith.constant 0 : index
    %22 = vector.load %arg5[%c0_17, %c0_18] : memref<128x16xbf16, #tpu.memory_space<vmem>>, vector<128x16xbf16>
    %cst_19 = arith.constant dense<0.000000e+00> : vector<16x16xf32>
    %23 = tpu.matmul %0, %22, %cst_19 {dimension_numbers = #tpu.dot_dimension_numbers<[1], [0], [0], [1], [0, 0, 1, 1], [], []>} : vector<16x128xbf16>, vector<128x16xbf16>, vector<16x16xf32> -> vector<16x16xf32>
    %24 = arith.truncf %23 : vector<16x16xf32> to vector<16x16xbf16>
    %c0_20 = arith.constant 0 : index
    %c0_21 = arith.constant 0 : index
    %25 = vector.load %arg6[%c0_20, %c0_21] : memref<16x128xbf16, #tpu.memory_space<vmem>>, vector<16x128xbf16>
    %cst_22 = arith.constant dense<0.000000e+00> : vector<16x128xf32>
    %26 = tpu.matmul %24, %25, %cst_22 {dimension_numbers = #tpu.dot_dimension_numbers<[1], [0], [0], [1], [0, 0, 1, 1], [], []>} : vector<16x16xbf16>, vector<16x128xbf16>, vector<16x128xf32> -> vector<16x128xf32>
    %27 = vector.broadcast %1 : f32 to vector<16x128xf32>
    %28 = arith.mulf %27, %21 : vector<16x128xf32>
    %29 = arith.addf %7, %28 : vector<16x128xf32>
    %30 = vector.broadcast %2 : f32 to vector<16x128xf32>
    %31 = arith.mulf %30, %26 : vector<16x128xf32>
    %32 = arith.addf %29, %31 : vector<16x128xf32>
    %c0_23 = arith.constant 0 : index
    %c0_24 = arith.constant 0 : index
    %33 = vector.load %arg11[%c0_23, %c0_24] : memref<16x128xf32, #tpu.memory_space<vmem>>, vector<16x128xf32>
    tpu.vector_store %arg11[%c0_23, %c0_24], %32 {strides = array<i32>} : memref<16x128xf32, #tpu.memory_space<vmem>>, vector<16x128xf32>,
    return
  }
  func.func @transform_0(%arg0: i32) -> i32 {
    %c0_i32 = arith.constant 0 : i32
    %c0_i32_0 = arith.constant 0 : i32
    return %c0_i32 : i32
  }
  func.func @transform_1(%arg0: i32) -> (i32, i32) {
    %c0_i32 = arith.constant 0 : i32
    %c0_i32_0 = arith.constant 0 : i32
    return %arg0, %c0_i32 : i32, i32
  }
  func.func @transform_2(%arg0: i32) -> (i32, i32) {
    %c0_i32 = arith.constant 0 : i32
    %c0_i32_0 = arith.constant 0 : i32
    %c0_i32_1 = arith.constant 0 : i32
    return %c0_i32, %c0_i32_0 : i32, i32
  }
  func.func @transform_3(%arg0: i32) -> (i32, i32) {
    %c0_i32 = arith.constant 0 : i32
    %c0_i32_0 = arith.constant 0 : i32
    %c0_i32_1 = arith.constant 0 : i32
    return %c0_i32, %c0_i32_0 : i32, i32
  }
  func.func @transform_4(%arg0: i32) -> (i32, i32) {
    %c0_i32 = arith.constant 0 : i32
    %c0_i32_0 = arith.constant 0 : i32
    %c0_i32_1 = arith.constant 0 : i32
    return %c0_i32, %c0_i32_0 : i32, i32
  }
  func.func @transform_5(%arg0: i32) -> (i32, i32) {
    %c0_i32 = arith.constant 0 : i32
    %c0_i32_0 = arith.constant 0 : i32
    %c0_i32_1 = arith.constant 0 : i32
    return %c0_i32, %c0_i32_0 : i32, i32
  }
  func.func @transform_6(%arg0: i32) -> (i32, i32) {
    %c0_i32 = arith.constant 0 : i32
    %c0_i32_0 = arith.constant 0 : i32
    %c0_i32_1 = arith.constant 0 : i32
    return %c0_i32, %c0_i32_0 : i32, i32
  }
  func.func @transform_7(%arg0: i32) -> (i32, i32) {
    %c0_i32 = arith.constant 0 : i32
    %c0_i32_0 = arith.constant 0 : i32
    %c0_i32_1 = arith.constant 0 : i32
    return %c0_i32, %c0_i32_0 : i32, i32
  }
  func.func @transform_8(%arg0: i32) -> (i32, i32) {
    %c0_i32 = arith.constant 0 : i32
    %c0_i32_0 = arith.constant 0 : i32
    %c0_i32_1 = arith.constant 0 : i32
    return %c0_i32, %c0_i32_0 : i32, i32
  }
  func.func @transform_9(%arg0: i32) -> (i32, i32) {
    %c0_i32 = arith.constant 0 : i32
    %c0_i32_0 = arith.constant 0 : i32
    %c0_i32_1 = arith.constant 0 : i32
    return %c0_i32, %c0_i32_0 : i32, i32
  }
  func.func @transform_10(%arg0: i32) -> (i32, i32) {
    %c0_i32 = arith.constant 0 : i32
    %c0_i32_0 = arith.constant 0 : i32
    return %arg0, %c0_i32 : i32, i32
  }
}

</mosaic_0001>

<bundles_post_ra>
// kernel: tpu_custom_call.1
= control target key start
LH: loop header
LB: loop body
LE: loop exit
PB: predicated region body
PF: predicated region fallthrough
CT: control target
= control target key end

     0   :  { %15 = vsyncpa [#allocation4], 0  ;;  %s941_s0 = inlined_call_operand.vmem [shape: f32[2], index: 0, kind: input, shape index: {}]   ;;  %s942_s1 = inlined_call_operand.vmem [shape: bf16[16,128], index: 1, kind: input, shape index: {}]   ;;  %s943_s2 = inlined_call_operand.vmem [shape: bf16[128,128], index: 2, kind: input, shape index: {}]   ;;  %s944_s3 = inlined_call_operand.vmem [shape: f32[1,128], index: 3, kind: input, shape index: {}]   ;;  %s945_s4 = inlined_call_operand.vmem [shape: bf16[128,16], index: 4, kind: input, shape index: {}]   ;;  %s946_s5 = inlined_call_operand.vmem [shape: bf16[16,128], index: 5, kind: input, shape index: {}]   ;;  %s947_s6 = inlined_call_operand.vmem [shape: bf16[128,16], index: 6, kind: input, shape index: {}]   ;;  %s948_s7 = inlined_call_operand.vmem [shape: f32[1,16], index: 7, kind: input, shape index: {}]   ;;  %s949_s8 = inlined_call_operand.vmem [shape: bf16[16,128], index: 8, kind: input, shape index: {}]   ;;  %s950_s9 = inlined_call_operand.vmem [shape: f32[1,128], index: 9, kind: input, shape index: {}]   ;;  %s951_s10 = inlined_call_operand.hbm [shape: f32[16,128], index: 10, kind: output, shape index: {}]  }
   0x1   :  { %16 = vsyncpa [#allocation3], 0  ;;  %s23_s15 = sshll.u32 %s941_s0, 4  ;;  %s24_s15 = int_to_ptr.vmem [resolvable:$true] %s23_s15 }
   0x2   :  { %s704_s16 = scalar_lea.vmem %s24_s15, 16  ;;  %p709_p1 = scmp.lt.s32.totalorder %s24_s15, %s24_s15 }
   0x3   :  { %p705_p0 = scmp.ne.s32.totalorder %s24_s15, %s704_s16  ;;  %p710_p2 = scmp.lt.s32.totalorder %s704_s16, %s704_s16 }
   0x5   :  { %p711_p3 = por %p710_p2, %p709_p1 }
   0x7   :  { %p712_p4 = pnand %p711_p3, %p705_p0 }
   0x9   :  { %715 = shalt.err (!%p712_p4)
}
   0xa   :  { %s740_s17 = smov [#allocation2]  }
   0xb   :  { %26 = dma.vmem_to_smem %s24_s15, 16, %s740_s17, [#allocation4]  }
   0xc   :  { %736 = dma.done.wait [#allocation4], 16  }
   0xd   :  { %737 = vsyncadd [#allocation4], 4294967280 }
   0xe   :  { %48 = sfence }
   0xf   :  { %v677_v0 = vld [vmem:[%s943_s2 + $0x38] sm:$0xff]   ;;  %v741_v1 = vmov 0.0   ;;  %v678_v2 = vld [vmem:[%s943_s2 + $0x30] sm:$0xff]   ;;  %vm742_vm0 = vmmov 0   ;;  %v679_v3 = vld [vmem:[%s943_s2 + $0x28] sm:$0xff]   ;;  %vm303_vm1 = vcmask 130048  }
  0x10   :  { %599 = vmatprep.subr.bf16.mxu0 %v741_v1  ;;  %619 = vmatprep.subr.bf16.mxu1 %v741_v1  ;;  %v686_v4 = vld [vmem:[%s947_s6 + $0x38] sm:$0xff]   ;;  %v680_v5 = vld [vmem:[%s943_s2 + $0x20] sm:$0xff]   ;;  %v687_v6 = vld [vmem:[%s947_s6 + $0x30] sm:$0xff]   ;;  %s743_s28 = smov [#allocation5]  }
  0x11   :  { %600 = vmatpush3.bf16.msra.mxu0 %v677_v0  ;;  %615 = vmatprep.mubr.msk.bf16.mxu0 %vm742_vm0, %v741_v1  ;;  %v681_v7 = vld [vmem:[%s943_s2 + $0x18] sm:$0xff]   ;;  %v688_v8 = vld [vmem:[%s947_s6 + $0x28] sm:$0xff]   ;;  %v682_v9 = vld [vmem:[%s943_s2 + $0x10] sm:$0xff]  }
  0x12   :  { %601 = vmatprep.subr.bf16.mxu0 %v741_v1  ;;  %635 = vmatprep.mubr.msk.bf16.mxu1 %vm742_vm0, %v741_v1  ;;  %v689_v10 = vld [vmem:[%s947_s6 + $0x20] sm:$0xff]   ;;  %v683_v11 = vld [vmem:[%s943_s2 + $0x8] sm:$0xff]   ;;  %v690_v12 = vld [vmem:[%s947_s6 + $0x18] sm:$0xff]  }
  0x13   :  { %620 = vmatpush3.bf16.msra.mxu1 %v686_v4  ;;  %v684_v13 = vld [vmem:[%s943_s2] sm:$0xff]   ;;  %v691_v14 = vld [vmem:[%s947_s6 + $0x10] sm:$0xff]   ;;  %v692_v16 = vld [vmem:[%s947_s6 + $0x8] sm:$0xff]  }
  0x14   :  { %621 = vmatprep.subr.bf16.mxu1 %v741_v1  ;;  %v685_v15 = vld [vmem:[%s942_s1] sm:$0xff]   ;;  %v694_v25 = vld [vmem:[%s945_s4 + $0x38] sm:$0xff]   ;;  %v695_v27 = vld [vmem:[%s945_s4 + $0x30] sm:$0xff]   ;;  %s523_s1 = sshll.u32 %s743_s28, 4  ;;  %s524_s1 = int_to_ptr.vmem [resolvable:$true] %s523_s1 }
  0x15   :  { %602 = vmatpush3.bf16.msra.mxu0 %v678_v2  ;;  %v693_v17 = vld [vmem:[%s947_s6] sm:$0xff]   ;;  %v696_v28 = vld [vmem:[%s945_s4 + $0x28] sm:$0xff]   ;;  %v698_v30 = vld [vmem:[%s945_s4 + $0x18] sm:$0xff]   ;;  %p721_p6 = scmp.lt.s32.totalorder %s524_s1, %s524_s1 }
  0x16   :  { %603 = vmatprep.subr.bf16.mxu0 %v741_v1  ;;  %v536_v19 = vld [vmem:[%s944_s3] ss:$0 sm:$0xff]  ;;  %v699_v31 = vld [vmem:[%s945_s4 + $0x10] sm:$0xff]   ;;  %v700_v32 = vld [vmem:[%s945_s4 + $0x8] sm:$0xff]  }
  0x17   :  { %622 = vmatpush3.bf16.msra.mxu1 %v687_v6  ;;  %v697_v29 = vld [vmem:[%s945_s4 + $0x20] sm:$0xff]  }
  0x18   :  { %623 = vmatprep.subr.bf16.mxu1 %v741_v1  ;;  %v701_v33 = vld [vmem:[%s945_s4] sm:$0xff]  }
  0x19   :  { %604 = vmatpush3.bf16.msra.mxu0 %v679_v3  ;;  %v702_v34 = vld [vmem:[%s949_s8] sm:$0xff]  }
  0x1a   :  { %605 = vmatprep.subr.bf16.mxu0 %v741_v1  ;;  %v546_v35 = vld [vmem:[%s948_s7] ss:$0 sm:$0xff]  ;;  %s52_s7 = sld [smem:[#allocation2]] }
  0x1b   :  { %624 = vmatpush3.bf16.msra.mxu1 %v688_v8  ;;  %v703_v44 = vld [vmem:[%s946_s5] sm:$0xff]   ;;  %s535_s5 = sld [smem:[#allocation2 + $0x1]] }
  0x1c   :  { %625 = vmatprep.subr.bf16.mxu1 %v741_v1  ;;  %v555_v55 = vld [vmem:[%s950_s9] ss:$0 sm:$0xff]  ;;  %s716_s9 = scalar_lea.vmem %s524_s1, 256 }
  0x1d   :  { %606 = vmatpush3.bf16.msra.mxu0 %v680_v5  ;;  %p717_p5 = scmp.ne.s32.totalorder %s524_s1, %s716_s9  ;;  %p722_p7 = scmp.lt.s32.totalorder %s716_s9, %s716_s9 }
  0x1e   :  { %607 = vmatprep.subr.bf16.mxu0 %v741_v1 }
  0x1f   :  { %626 = vmatpush3.bf16.msra.mxu1 %v689_v10  ;;  %p723_p8 = por %p722_p7, %p721_p6 }
  0x20   :  { %627 = vmatprep.subr.bf16.mxu1 %v741_v1  ;;  %v506_v57 = vstv %s52_s7 }
  0x21   :  { %608 = vmatpush3.bf16.msra.mxu0 %v681_v7  ;;  %v511_v60 = vstv %s535_s5  ;;  %p724_p9 = pnand %p723_p8, %p717_p5 }
  0x22   :  { %609 = vmatprep.subr.bf16.mxu0 %v741_v1 }
  0x23   :  { %628 = vmatpush3.bf16.msra.mxu1 %v690_v12 }
  0x24   :  { %629 = vmatprep.subr.bf16.mxu1 %v741_v1 }
  0x25   :  { %610 = vmatpush3.bf16.msra.mxu0 %v682_v9 }
  0x26   :  { %611 = vmatprep.subr.bf16.mxu0 %v741_v1 }
  0x27   :  { %630 = vmatpush3.bf16.msra.mxu1 %v691_v14 }
  0x28   :  { %631 = vmatprep.subr.bf16.mxu1 %v741_v1 }
  0x29   :  { %612 = vmatpush3.bf16.msra.mxu0 %v683_v11 }
  0x2a   :  { %613 = vmatprep.subr.bf16.mxu0 %v741_v1 }
  0x2b   :  { %632 = vmatpush3.bf16.msra.mxu1 %v692_v16 }
  0x2c   :  { %633 = vmatprep.subr.bf16.mxu1 %v741_v1 }
  0x2d   :  { %614 = vmatpush3.bf16.msra.mxu0 %v684_v13 }
  0x2e   :  { %639 = vmatprep.subr.bf16.mxu0 %v741_v1 }
  0x2f   :  { %634 = vmatpush3.bf16.msra.mxu1 %v693_v17 }
  0x30   :  { %616 = vmatmul.mubr.bf16.vlgmr.msra.gmra.mxu0 %v685_v15  ;;  %645 = vmatprep.subr.bf16.mxu1 %v741_v1 }
  0x31   :  { %641 = vmatprep.mubr.msk.bf16.mxu0 %vm742_vm0, %v741_v1  ;;  %640 = vmatpush3.bf16.msra.mxu0 %v702_v34 }
  0x32   :  { %665 = vmatprep.subr.bf16.mxu0 %v741_v1 }
  0xf0   :  { %v165_v18 = vpop.f32.mrf.mxu0 }
  0xf1   :  { %v882_v22 = vadd.f32 %v536_v19, %v165_v18 }
  0xf2   :  { %v617_v20 = vpop.f32.mrf.mxu0 }
  0xf4   :  { %v168_v21 = vpop.f32.mrf.mxu0 }
  0xf5   :  { %v884_v23 = vadd.f32 %v536_v19, %v168_v21 }
  0xf6   :  { %v618_v24 = vpop.f32.mrf.mxu0 }
  0xf7   :  { %v172_v26 = vpack.c.bf16 %v884_v23, %v882_v22 }
  0xf9   :  { %636 = vmatmul.mubr.bf16.vlgmr.msra.gmra.mxu1 %v172_v26 }
  0xfa   :  { %646 = vmatpush3.bf16.msra.mxu1 %v694_v25  ;;  %661 = vmatprep.mubr.msk.bf16.mxu1 %vm742_vm0, %v741_v1 }
  0xfb   :  { %647 = vmatprep.subr.bf16.mxu1 %v741_v1 }
  0xfe   :  { %648 = vmatpush3.bf16.msra.mxu1 %v695_v27 }
  0xff   :  { %649 = vmatprep.subr.bf16.mxu1 %v741_v1 }
 0x102   :  { %650 = vmatpush3.bf16.msra.mxu1 %v696_v28 }
 0x103   :  { %651 = vmatprep.subr.bf16.mxu1 %v741_v1 }
 0x106   :  { %652 = vmatpush3.bf16.msra.mxu1 %v697_v29 }
 0x107   :  { %653 = vmatprep.subr.bf16.mxu1 %v741_v1 }
 0x10a   :  { %654 = vmatpush3.bf16.msra.mxu1 %v698_v30 }
 0x10b   :  { %655 = vmatprep.subr.bf16.mxu1 %v741_v1 }
 0x10e   :  { %656 = vmatpush3.bf16.msra.mxu1 %v699_v31 }
 0x10f   :  { %657 = vmatprep.subr.bf16.mxu1 %v741_v1 }
 0x112   :  { %658 = vmatpush3.bf16.msra.mxu1 %v700_v32 }
 0x113   :  { %659 = vmatprep.subr.bf16.mxu1 %v741_v1 }
 0x116   :  { %660 = vmatpush3.bf16.msra.mxu1 %v701_v33 }
 0x119   :  { %662 = vmatmul.mubr.bf16.vlgmr.msra.gmra.mxu1 %v685_v15 }
 0x1b9   :  { %v278_v36 = vpop.f32.mrf.mxu1 }
 0x1ba   :  { %v279_v38 = vadd.f32 %v546_v35, %v278_v36 }
 0x1bb   :  { %v637_v37 = vpop.f32.mrf.mxu1 }
 0x1bc   :  { %v285_v42 = vmax.f32 %v279_v38, 0.0 }
 0x1bd   :  { %v281_v39 = vpop.f32.mrf.mxu1 }
 0x1be   :  { %v282_v40 = vadd.f32 %v546_v35, %v281_v39 }
 0x1bf   :  { %v638_v41 = vpop.f32.mrf.mxu1 }
 0x1c0   :  { %v286_v43 = vmax.f32 %v282_v40, 0.0 }
 0x1c2   :  { %v287_v45 = vpack.c.bf16 %v286_v43, %v285_v42 }
 0x1c4   :  { %642 = vmatmul.mubr.msk.bf16.vlgmr.msra.gmra.mxu0 %vm303_vm1, %v287_v45 }
 0x1c5   :  { %666 = vmatpush3.bf16.msra.mxu0 %v703_v44  ;;  %667 = vmatprep.mubr.msk.bf16.mxu0 %vm742_vm0, %v741_v1 }
 0x1d9   :  { %v446_v46 = vpop.f32.mrf.mxu1 }
 0x1db   :  { %v663_v47 = vpop.f32.mrf.mxu1 }
 0x1dd   :  { %v449_v48 = vpop.f32.mrf.mxu1 }
 0x1de   :  { %v453_v49 = vpack.c.bf16 %v449_v48, %v446_v46 }
 0x1df   :  { %v664_v50 = vpop.f32.mrf.mxu1 }
 0x1e0   :  { %668 = vmatmul.mubr.msk.bf16.vlgmr.msra.gmra.mxu0 %vm303_vm1, %v453_v49 }
 0x284   :  { %v341_v51 = vpop.f32.mrf.mxu0 }
 0x285   :  { %v342_v56 = vadd.f32 %v555_v55, %v341_v51 }
 0x286   :  { %v643_v52 = vpop.f32.mrf.mxu0 }
 0x287   :  { %v507_v58 = vmul.f32 %v506_v57, %v342_v56 }
 0x288   :  { %v344_v53 = vpop.f32.mrf.mxu0 }
 0x289   :  { %v345_v59 = vadd.f32 %v555_v55, %v344_v53  ;;  %v509_v63 = vadd.f32 %v507_v58, %v882_v22 }
 0x28a   :  { %v644_v54 = vpop.f32.mrf.mxu0 }
 0x28b   :  { %v508_v62 = vmul.f32 %v506_v57, %v345_v59 }
 0x28d   :  { %v510_v4 = vadd.f32 %v508_v62, %v884_v23 }
 0x2a0   :  { %v499_v61 = vpop.f32.mrf.mxu0 }
 0x2a1   :  { %v512_v0 = vmul.f32 %v511_v60, %v499_v61 }
 0x2a2   :  { %v669_v1 = vpop.f32.mrf.mxu0 }
 0x2a3   :  { %v514_v2 = vadd.f32 %v512_v0, %v509_v63 }
 0x2a4   :  { %v502_v3 = vpop.f32.mrf.mxu0 }
 0x2a5   :  { %516 = vst [vmem:[#allocation5] sm:$0xff] %v514_v2  ;;  %v513_v5 = vmul.f32 %v511_v60, %v502_v3 }
 0x2a6   :  { %v670_v6 = vpop.f32.mrf.mxu0 }
 0x2a7   :  { %v515_v7 = vadd.f32 %v513_v5, %v510_v4 }
 0x2a9   :  { %517 = vst [vmem:[#allocation5 + $0x8] sm:$0xff] %v515_v7 }
 0x2aa   :  { %727 = shalt.err (!%p724_p9)
}
 0x2ab   :  { %s744_s29 = smov 128   ;;  %s745_s30 = smov 8  }
 0x2ac   :  { %529 = dma.vmem_to_hbm [thread:$0]  %s524_s1, 256, %s951_s10, [#allocation3], %s744_s29, %s744_s29, %s745_s30  }
 0x2ad   :  { %738 = dma.done.wait [#allocation3], 256  }
 0x2ae   :  { %739 = vsyncadd [#allocation3], 4294967040 }
 0x2af   :  { %533 = vsyncpa [#allocation3], 1 }
 0x2b0   :  { %534 = vsyncpa [#allocation4], 1 }

</bundles_post_ra>
